<compile_context>
chip_gen: v7x
topology: tpu7x:2x2x1
jax: 0.10.0
libtpu: 0.0.40
codegen_flags: <defaults>
</compile_context>

<pallas_src>
import math
import numpy as np
import jax
import jax.numpy as jnp
from jax import lax
from jax.experimental import pallas as pl
from jax.experimental.pallas import tpu as pltpu


def _round_up(x, m):
    return (x + m - 1) // m * m


def _make_tokenizer_kernel(cat_slices, ntd, ntd_pad):
    """cat_slices: static tuple of (vocab_offset, vocab_size) per categorical feature."""

    def kernel(x_num_ref, x_cat_ref, p_num_ref, emb_ref, out_ref):
        tb = x_num_ref.shape[0]

        # Numerical tokens, already in the flattened (TB, dn1*D) layout; the full
        # per-token bias is folded into P_num row 0 and recovered through the
        # constant-1 feature column.
        parts = [jnp.dot(x_num_ref[...], p_num_ref[...],
                         preferred_element_type=jnp.float32)]          # (TB, dn1*D)

        x_cat = x_cat_ref[...]                                          # (TB, n_cat) int32
        # Categorical tokens: per-category one-hot gather on the MXU.  No global
        # (TB, n_vocab) VALU loop and no n_tokens x padded projector: total
        # compare work is one pass over the vocabulary.
        for c, (off, size) in enumerate(cat_slices):
            local_iota = lax.broadcasted_iota(jnp.int32, (tb, size), 1)
            onehot = (local_iota == x_cat[:, c:c + 1]).astype(emb_ref.dtype)
            parts.append(jnp.dot(onehot, emb_ref[off:off + size, :],
                                 preferred_element_type=jnp.float32))  # (TB, D)

        flat = jnp.concatenate(parts, axis=-1)                          # (TB, ntd)
        if ntd_pad != ntd:   # keep the output store lane-dense / unmasked
            flat = jnp.concatenate(
                [flat, jnp.zeros((tb, ntd_pad - ntd), flat.dtype)], axis=-1)
        out_ref[...] = flat.astype(out_ref.dtype)                       # single full-tile store

    return kernel


def make_tokenizer_params(weight, bias, emb_table, categories, *,
                          compute_dtype=jnp.float32):
    """Parameter-only preprocessing.  Call ONCE at model init (hoisted out of the
    per-forward path).  Builds:
      * p_num  (dn1, dn1*D): block-diagonal numeric projector with the full
        per-token bias folded into row 0 (the constant-1 feature row).
      * emb_adj (n_vocab, D): embedding table with each row's owning
        categorical-token bias folded in.
    """
    dn1, d_token = weight.shape                    # dn1 = d_numerical + 1
    n_cat = len(categories)
    d_numerical = dn1 - 1
    assert bias.shape == (d_numerical + n_cat, d_token)

    offsets = np.cumsum([0] + list(categories[:-1]))
    cat_slices = tuple((int(o), int(s)) for o, s in zip(offsets, categories))

    # bias_full[t] is the bias of token t (row 0 = the constant-1 token = zeros).
    bias_full = jnp.concatenate(
        [jnp.zeros((1, d_token), bias.dtype), bias], axis=0)            # (n_tokens, D)

    # P_num[f, t*D + d] = weight[f, d] if t == f else 0, plus bias in row 0.
    eye = jnp.eye(dn1, dtype=weight.dtype)
    p_num = (eye[:, :, None] * weight[None, :, :]).reshape(dn1, dn1 * d_token)
    p_num = p_num.at[0].add(bias_full[:dn1].reshape(dn1 * d_token))

    # emb_adj[v] = emb[v] + bias of the categorical token owning vocab row v.
    c_of_v = jnp.asarray(np.repeat(np.arange(n_cat), categories), jnp.int32)
    emb_adj = emb_table + bias_full[dn1:][c_of_v]

    params = {"p_num": p_num.astype(compute_dtype),
              "emb_adj": emb_adj.astype(compute_dtype)}
    cfg = {"d_token": int(d_token), "dn1": int(dn1), "n_cat": int(n_cat),
           "cat_slices": cat_slices}
    return params, cfg


def tokenizer_forward(params, cfg, x_num, x_cat, *, out_dtype=None):
    p_num, emb_adj = params["p_num"], params["emb_adj"]
    compute_dtype = p_num.dtype
    B = x_num.shape[0]
    dn1, d_token, n_cat = cfg["dn1"], cfg["d_token"], cfg["n_cat"]
    cat_slices = cfg["cat_slices"]
    n_tokens = dn1 + n_cat
    ntd = n_tokens * d_token
    ntd_pad = _round_up(ntd, 128)                 # lane-dense, unmasked output stores
    if out_dtype is None:
        # bf16 output halves the (dominant) HBM writeback when downstream allows.
        out_dtype = jnp.promote_types(x_num.dtype, compute_dtype)

    # Per-batch inputs.
    x_num_ext = jnp.concatenate(
        [jnp.ones((B, 1), x_num.dtype), x_num], axis=1).astype(compute_dtype)
    x_cat_i = x_cat.astype(jnp.int32)

    # Batch tiling: big tiles amortize the ~0.35us/step pipeline overhead, but
    # keep >= 2 grid steps (when B allows) so dimension_semantics=("parallel",)
    # can shard the batch across the 2 TensorCores on v7x.
    if B <= 8:
        tb = B
    else:
        tb = max(8, (min(512, (B + 1) // 2) // 8) * 8)
    grid = (pl.cdiv(B, tb),)

    # VMEM budget derived from the actual (double-buffered) footprint.
    isz = lambda dt: jnp.dtype(dt).itemsize
    vmem_est = 2 * (tb * dn1 * isz(compute_dtype) + tb * n_cat * 4
                    + tb * ntd_pad * isz(out_dtype)
                    + p_num.size * isz(compute_dtype)
                    + emb_adj.size * isz(compute_dtype)) + (4 << 20)
    vmem_limit = int(min(max(vmem_est, 32 << 20), 56 << 20))   # 56 MiB: safe on v7x

    kernel = _make_tokenizer_kernel(cat_slices, ntd, ntd_pad)

    out_flat = pl.pallas_call(
        kernel,
        out_shape=jax.ShapeDtypeStruct((B, ntd_pad), out_dtype),
        grid=grid,
        in_specs=[
            pl.BlockSpec((tb, dn1), lambda i: (i, 0)),         # x_num_ext (batch tile)
            pl.BlockSpec((tb, n_cat), lambda i: (i, 0)),       # x_cat     (batch tile)
            # Grid-invariant operands are parameter-sized (the raw embedding
            # table, not an n_tokens x padded projector), so the default
            # double-buffering costs little VMEM.
            # TODO(synk): at very large vocabularies pass pipeline_mode=
            # pl.Buffered(1) here or switch to a scalar-prefetch row gather.
            pl.BlockSpec(p_num.shape, lambda i: (0, 0)),       # P_num (+bias)
            pl.BlockSpec(emb_adj.shape, lambda i: (0, 0)),     # emb table (+cat bias)
        ],
        out_specs=pl.BlockSpec((tb, ntd_pad), lambda i: (i, 0)),   # lane-dense tile
        compiler_params=pltpu.CompilerParams(
            dimension_semantics=("parallel",),
            vmem_limit_bytes=vmem_limit,
        ),
    )(x_num_ext, x_cat_i, p_num, emb_adj)

    if ntd_pad != ntd:
        out_flat = out_flat[:, :ntd]
    return out_flat.reshape(B, n_tokens, d_token)


def reference_forward(x_num, x_cat, weight, bias, emb_table, category_offsets):
    # Plain-JAX transcription of the PyTorch forward, for verification.
    B = x_num.shape[0]
    xn = jnp.concatenate([jnp.ones((B, 1), x_num.dtype), x_num], axis=1)
    x = weight[None] * xn[:, :, None]
    cat_emb = emb_table[x_cat + category_offsets[None]]
    x = jnp.concatenate([x, cat_emb], axis=1)
    bias_full = jnp.concatenate(
        [jnp.zeros((1, weight.shape[1]), bias.dtype), bias], axis=0)
    return x + bias_full[None]


if __name__ == "__main__":
    key = jax.random.PRNGKey(0)
    B, d_numerical, d_token = 2, 4, 32
    categories = [3, 5, 7]
    n_cat = len(categories)
    n_vocab = sum(categories)
    category_offsets = jnp.asarray(np.cumsum([0] + categories[:-1]), dtype=jnp.int32)

    k1, k2, k3, k4, k5 = jax.random.split(key, 5)
    # kaiming_uniform_(a=sqrt(5)) on a (rows, d_token) tensor -> U(-1/sqrt(d_token), 1/sqrt(d_token))
    bound = 1.0 / math.sqrt(d_token)
    weight = jax.random.uniform(k1, (d_numerical + 1, d_token), jnp.float32, -bound, bound)
    bias = jax.random.uniform(k2, (d_numerical + n_cat, d_token), jnp.float32, -bound, bound)
    emb_table = jax.random.uniform(k3, (n_vocab, d_token), jnp.float32, -bound, bound)

    x_num = jax.random.normal(k4, (B, d_numerical), jnp.float32)
    x_cat = jnp.stack(
        [jax.random.randint(jax.random.fold_in(k5, i), (B,), 0, c)
         for i, c in enumerate(categories)], axis=1).astype(jnp.int32)

    ref = reference_forward(x_num, x_cat, weight, bias, emb_table, category_offsets)

    # f32 path (parity with the PyTorch f32 forward).  Parameter preprocessing is
    # done once, outside the per-call path.
    params, cfg = make_tokenizer_params(weight, bias, emb_table, categories,
                                        compute_dtype=jnp.float32)
    out = jax.block_until_ready(tokenizer_forward(params, cfg, x_num, x_cat))
    assert out.shape == (B, d_numerical + 1 + n_cat, d_token)
    # Tolerance covers the MXU's default f32 matmul precision (bf16-pass
    # decomposition); pass precision=lax.Precision.HIGHEST for bit-level parity.
    np.testing.assert_allclose(np.asarray(out), np.asarray(ref), rtol=5e-3, atol=5e-4)

    # bf16 fast path: bf16 MXU operands + bf16 writeback (production configuration).
    params16, cfg16 = make_tokenizer_params(weight, bias, emb_table, categories,
                                            compute_dtype=jnp.bfloat16)
    out16 = jax.block_until_ready(
        tokenizer_forward(params16, cfg16, x_num, x_cat, out_dtype=jnp.bfloat16))
    np.testing.assert_allclose(np.asarray(out16.astype(jnp.float32)), np.asarray(ref),
                               rtol=5e-2, atol=1e-2)

    print("KERNEL_OK")
</pallas_src>

<mosaic_0001>
module attributes {stable_mosaic.version = 11 : i64} {
  func.func @kernel(%arg0: i32, %arg1: memref<2x5xf32, #tpu.memory_space<vmem>>, %arg2: memref<2x3xi32, #tpu.memory_space<vmem>>, %arg3: memref<5x160xf32, #tpu.memory_space<vmem>>, %arg4: memref<15x32xf32, #tpu.memory_space<vmem>>, %arg5: memref<2x256xf32, #tpu.memory_space<vmem>>) attributes {dimension_semantics = [#tpu.dimension_semantics<parallel>], iteration_bounds = array<i64: 1>, scalar_prefetch = 0 : i64, scratch_operands = 0 : i64, tpu.core_type = #tpu.core_type<tc>, window_params = [{transform_indices = @transform_0, window_bounds = array<i64: 2, 5>}, {transform_indices = @transform_1, window_bounds = array<i64: 2, 3>}, {pipeline_mode = #tpu.pipeline_mode<synchronous>, transform_indices = @transform_2, window_bounds = array<i64: 5, 160>}, {pipeline_mode = #tpu.pipeline_mode<synchronous>, transform_indices = @transform_3, window_bounds = array<i64: 15, 32>}, {transform_indices = @transform_4, window_bounds = array<i64: 2, 256>}]} {
    %c0 = arith.constant 0 : index
    %c0_0 = arith.constant 0 : index
    %0 = vector.load %arg1[%c0, %c0_0] : memref<2x5xf32, #tpu.memory_space<vmem>>, vector<2x5xf32>
    %c0_1 = arith.constant 0 : index
    %c0_2 = arith.constant 0 : index
    %1 = vector.load %arg3[%c0_1, %c0_2] : memref<5x160xf32, #tpu.memory_space<vmem>>, vector<5x160xf32>
    %cst = arith.constant dense<0.000000e+00> : vector<2x160xf32>
    %2 = tpu.matmul %0, %1, %cst {dimension_numbers = #tpu.dot_dimension_numbers<[1], [0], [0], [1], [0, 0, 1, 1], [], []>} : vector<2x5xf32>, vector<5x160xf32>, vector<2x160xf32> -> vector<2x160xf32>
    %c0_3 = arith.constant 0 : index
    %c0_4 = arith.constant 0 : index
    %3 = vector.load %arg2[%c0_3, %c0_4] : memref<2x3xi32, #tpu.memory_space<vmem>>, vector<2x3xi32>
    %4 = tpu.iota {dimensions = array<i32: 1>} : vector<2x3xi32>
    %5 = vector.extract_strided_slice %3 {offsets = [0, 0], sizes = [2, 1], strides = [1, 1]} : vector<2x3xi32> to vector<2x1xi32>
    %6 = vector.broadcast %5 : vector<2x1xi32> to vector<2x3xi32>
    %7 = arith.cmpi eq, %4, %6 : vector<2x3xi32>
    %8 = arith.extui %7 : vector<2x3xi1> to vector<2x3xi32>
    %9 = arith.sitofp %8 : vector<2x3xi32> to vector<2x3xf32>
    %c0_5 = arith.constant 0 : index
    %c0_6 = arith.constant 0 : index
    %10 = vector.load %arg4[%c0_5, %c0_6] : memref<15x32xf32, #tpu.memory_space<vmem>>, vector<3x32xf32>
    %cst_7 = arith.constant dense<0.000000e+00> : vector<2x32xf32>
    %11 = tpu.matmul %9, %10, %cst_7 {dimension_numbers = #tpu.dot_dimension_numbers<[1], [0], [0], [1], [0, 0, 1, 1], [], []>} : vector<2x3xf32>, vector<3x32xf32>, vector<2x32xf32> -> vector<2x32xf32>
    %12 = tpu.iota {dimensions = array<i32: 1>} : vector<2x5xi32>
    %13 = vector.extract_strided_slice %3 {offsets = [0, 1], sizes = [2, 1], strides = [1, 1]} : vector<2x3xi32> to vector<2x1xi32>
    %14 = vector.broadcast %13 : vector<2x1xi32> to vector<2x5xi32>
    %15 = arith.cmpi eq, %12, %14 : vector<2x5xi32>
    %16 = arith.extui %15 : vector<2x5xi1> to vector<2x5xi32>
    %17 = arith.sitofp %16 : vector<2x5xi32> to vector<2x5xf32>
    %c3 = arith.constant 3 : index
    %c0_8 = arith.constant 0 : index
    %18 = vector.load %arg4[%c3, %c0_8] : memref<15x32xf32, #tpu.memory_space<vmem>>, vector<5x32xf32>
    %cst_9 = arith.constant dense<0.000000e+00> : vector<2x32xf32>
    %19 = tpu.matmul %17, %18, %cst_9 {dimension_numbers = #tpu.dot_dimension_numbers<[1], [0], [0], [1], [0, 0, 1, 1], [], []>} : vector<2x5xf32>, vector<5x32xf32>, vector<2x32xf32> -> vector<2x32xf32>
    %20 = tpu.iota {dimensions = array<i32: 1>} : vector<2x7xi32>
    %21 = vector.extract_strided_slice %3 {offsets = [0, 2], sizes = [2, 1], strides = [1, 1]} : vector<2x3xi32> to vector<2x1xi32>
    %22 = vector.broadcast %21 : vector<2x1xi32> to vector<2x7xi32>
    %23 = arith.cmpi eq, %20, %22 : vector<2x7xi32>
    %24 = arith.extui %23 : vector<2x7xi1> to vector<2x7xi32>
    %25 = arith.sitofp %24 : vector<2x7xi32> to vector<2x7xf32>
    %c8 = arith.constant 8 : index
    %c0_10 = arith.constant 0 : index
    %26 = vector.load %arg4[%c8, %c0_10] : memref<15x32xf32, #tpu.memory_space<vmem>>, vector<7x32xf32>
    %cst_11 = arith.constant dense<0.000000e+00> : vector<2x32xf32>
    %27 = tpu.matmul %25, %26, %cst_11 {dimension_numbers = #tpu.dot_dimension_numbers<[1], [0], [0], [1], [0, 0, 1, 1], [], []>} : vector<2x7xf32>, vector<7x32xf32>, vector<2x32xf32> -> vector<2x32xf32>
    %28 = tpu.concatenate %2, %11, %19, %27 in 1 : vector<2x160xf32>, vector<2x32xf32>, vector<2x32xf32>, vector<2x32xf32> -> vector<2x256xf32>
    %c0_12 = arith.constant 0 : index
    %c0_13 = arith.constant 0 : index
    %29 = vector.load %arg5[%c0_12, %c0_13] : memref<2x256xf32, #tpu.memory_space<vmem>>, vector<2x256xf32>
    tpu.vector_store %arg5[%c0_12, %c0_13], %28 {strides = array<i32>} : memref<2x256xf32, #tpu.memory_space<vmem>>, vector<2x256xf32>,
    return
  }
  func.func @transform_0(%arg0: i32) -> (i32, i32) {
    %c0_i32 = arith.constant 0 : i32
    %c0_i32_0 = arith.constant 0 : i32
    return %arg0, %c0_i32 : i32, i32
  }
  func.func @transform_1(%arg0: i32) -> (i32, i32) {
    %c0_i32 = arith.constant 0 : i32
    %c0_i32_0 = arith.constant 0 : i32
    return %arg0, %c0_i32 : i32, i32
  }
  func.func @transform_2(%arg0: i32) -> (i32, i32) {
    %c0_i32 = arith.constant 0 : i32
    %c0_i32_0 = arith.constant 0 : i32
    %c0_i32_1 = arith.constant 0 : i32
    return %c0_i32, %c0_i32_0 : i32, i32
  }
  func.func @transform_3(%arg0: i32) -> (i32, i32) {
    %c0_i32 = arith.constant 0 : i32
    %c0_i32_0 = arith.constant 0 : i32
    %c0_i32_1 = arith.constant 0 : i32
    return %c0_i32, %c0_i32_0 : i32, i32
  }
  func.func @transform_4(%arg0: i32) -> (i32, i32) {
    %c0_i32 = arith.constant 0 : i32
    %c0_i32_0 = arith.constant 0 : i32
    return %arg0, %c0_i32 : i32, i32
  }
}

</mosaic_0001>

<bundles_post_ra>
// kernel: tpu_custom_call.1
= control target key start
LH: loop header
LB: loop body
LE: loop exit
PB: predicated region body
PF: predicated region fallthrough
CT: control target
= control target key end

     0   :  { %9 = vsyncpa [#allocation3], 0  ;;  %s686_s0 = inlined_call_operand.hbm [shape: f32[2,5], index: 0, kind: input, shape index: {}]   ;;  %s687_s1 = inlined_call_operand.vmem [shape: s32[2,3], index: 1, kind: input, shape index: {}]   ;;  %s688_s2 = inlined_call_operand.hbm [shape: f32[5,160], index: 2, kind: input, shape index: {}]   ;;  %s689_s3 = inlined_call_operand.hbm [shape: f32[15,32], index: 3, kind: input, shape index: {}]   ;;  %s690_s4 = inlined_call_operand.hbm [shape: f32[2,256], index: 4, kind: output, shape index: {}]  }
   0x1   :  { %10 = vsyncpa [#allocation6], 0 }
   0x2   :  { %11 = vsyncpa [#allocation4], 0  ;;  %s588_s15 = smov [#allocation5]   ;;  %s589_s17 = smov [#allocation2]  }
   0x3   :  { %s30_s16 = sshll.u32 %s588_s15, 4  ;;  %s18_s18 = sshll.u32 %s589_s17, 4  ;;  %s31_s16 = int_to_ptr.vmem [resolvable:$true] %s30_s16  ;;  %s19_s18 = int_to_ptr.vmem [resolvable:$true] %s18_s18 }
   0x4   :  { %s494_s21 = scalar_lea.hbm %s688_s2, 256 }
   0x5   :  { %p495_p0 = scmp.ne.s32.totalorder %s688_s2, %s494_s21  ;;  %p498_p1 = scmp.lt.u32.totalorder %s494_s21, %s688_s2 }
   0x7   :  { %p500_p2 = pnand %p498_p1, %p495_p0 }
   0x9   :  { %503 = shalt.err (!%p500_p2)
}
   0xa   :  { %s504_s26 = scalar_lea.vmem %s31_s16, 256  ;;  %p509_p4 = scmp.lt.s32.totalorder %s31_s16, %s31_s16 }
   0xb   :  { %p505_p3 = scmp.ne.s32.totalorder %s31_s16, %s504_s26  ;;  %p510_p5 = scmp.lt.s32.totalorder %s504_s26, %s504_s26 }
   0xd   :  { %p511_p6 = por %p510_p5, %p509_p4 }
   0xf   :  { %p512_p7 = pnand %p511_p6, %p505_p3 }
  0x11   :  { %515 = shalt.err (!%p512_p7)
}
  0x12   :  { %33 = dma.hbm_to_vmem [thread:$0]  %s688_s2, 256, %s31_s16, [#allocation6]  }
  0x13   :  { %s516_s5 = scalar_lea.hbm %s686_s0, 32 }
  0x14   :  { %p517_p8 = scmp.ne.s32.totalorder %s686_s0, %s516_s5  ;;  %p520_p9 = scmp.lt.u32.totalorder %s516_s5, %s686_s0 }
  0x16   :  { %p522_p10 = pnand %p520_p9, %p517_p8 }
  0x18   :  { %525 = shalt.err (!%p522_p10)
}
  0x19   :  { %s526_s10 = scalar_lea.vmem %s19_s18, 32  ;;  %p531_p12 = scmp.lt.s32.totalorder %s19_s18, %s19_s18 }
  0x1a   :  { %p527_p11 = scmp.ne.s32.totalorder %s19_s18, %s526_s10  ;;  %p532_p13 = scmp.lt.s32.totalorder %s526_s10, %s526_s10 }
  0x1c   :  { %p533_p0 = por %p532_p13, %p531_p12 }
  0x1e   :  { %p534_p1 = pnand %p533_p0, %p527_p11 }
  0x20   :  { %537 = shalt.err (!%p534_p1)
}
  0x21   :  { %21 = dma.hbm_to_vmem [thread:$0]  %s686_s0, 32, %s19_s18, [#allocation3]  }
  0x22   :  { %s590_s12 = smov [#allocation7]   ;;  %s538_s16 = scalar_lea.hbm %s689_s3, 256 }
  0x23   :  { %s39_s13 = sshll.u32 %s590_s12, 4  ;;  %p539_p2 = scmp.ne.s32.totalorder %s689_s3, %s538_s16  ;;  %s40_s13 = int_to_ptr.vmem [resolvable:$true] %s39_s13 }
  0x24   :  { %p542_p3 = scmp.lt.u32.totalorder %s538_s16, %s689_s3 }
  0x26   :  { %p544_p4 = pnand %p542_p3, %p539_p2 }
  0x28   :  { %547 = shalt.err (!%p544_p4)
}
  0x29   :  { %s548_s22 = scalar_lea.vmem %s40_s13, 256  ;;  %p553_p6 = scmp.lt.s32.totalorder %s40_s13, %s40_s13 }
  0x2a   :  { %p549_p5 = scmp.ne.s32.totalorder %s40_s13, %s548_s22  ;;  %p554_p7 = scmp.lt.s32.totalorder %s548_s22, %s548_s22 }
  0x2c   :  { %p555_p8 = por %p554_p7, %p553_p6 }
  0x2e   :  { %p556_p9 = pnand %p555_p8, %p549_p5 }
  0x30   :  { %559 = shalt.err (!%p556_p9)
}
  0x31   :  { %s591_s0 = smov 128   ;;  %s592_s18 = smov 8  }
  0x32   :  { %45 = dma.hbm_to_vmem [thread:$0]  %s689_s3, 256, %s40_s13, [#allocation6], %s591_s0, %s591_s0, %s592_s18  }
  0x33   :  { %582 = dma.done.wait [#allocation3], 32  }
  0x34   :  { %583 = vsyncadd [#allocation3], 4294967264 }
  0x35   :  { %584 = dma.done.wait [#allocation6], 512  }
  0x36   :  { %585 = vsyncadd [#allocation6], 4294966784  ;;  %v593_v0 = vmov 0   ;;  %v594_v1 = vmov 2   ;;  %v595_v2 = vmov 0.0   ;;  %vm62_vm0 = vcmask 1044480  }
  0x37   :  { %490 = vset.pattern.permute.xlu0 %v593_v0  ;;  %492 = vset.pattern.permute.xlu1 %v594_v1  ;;  %v140_v3 = vld [vmem:[%s687_s1] sm:$0x3]  ;;  %v57_v4 = vld [vmem:[#allocation5 + $0x8] sm:$0x1f]  ;;  %v56_v5 = vld [vmem:[#allocation5] sm:$0x1f]  ;;  %v141_v10 = vlaneseq }
  0x38   :  { %461 = vmatprep.subr.mxu1 %v595_v2  ;;  %133 = vmatprep.mubr.f32.mxu0 %v595_v2  ;;  %v149_v6 = vld [vmem:[#allocation7] sm:$0x7]  ;;  %vm154_vm1 = vcmask 1042432   ;;  %v55_v7 = vld [vmem:[#allocation2] sm:$0x3]  ;;  %vm58_vm2 = vcmask 39936  }
  0x39   :  { %144 = vperm.xlu0 %490, %v140_v3   ;;  %312 = vperm.xlu1 %492, %v140_v3   ;;  %vm596_vm3 = vmmov 0   ;;  %v234_v8 = vld [vmem:[#allocation7 + $0x3] sm:$0x1f]  ;;  %v597_v9 = vmov 1   ;;  %v142_v11 = vand.u32 127, %v141_v10  ;;  %vm150_vm4 = vcmask 23552  }
  0x3a   :  { %442 = vmatprep.subr.msk.mxu0 %vm62_vm0, %v57_v4  ;;  %462 = vmatpush3.msk.msra.mxu1 %vm154_vm1, %v149_v6  ;;  %v317_v14 = vld [vmem:[#allocation7 + $0x8] sm:$0x7f]  ;;  %vm322_vm7 = vcmask 1046528   ;;  %vm318_vm8 = vcmask 56320   ;;  %s598_s1 = smov 32   ;;  %s599_s3 = smov 96  }
  0x3b   :  { %443 = vmatpush1.msk.msra.mxu0 %vm62_vm0, %v56_v5  ;;  %463 = vmatprep.mubr.msk.f32.mxu1 %vm596_vm3, %v595_v2  ;;  %s600_s27 = smov 64   ;;  %vm408_vm10 = vcmask 261120   ;;  %vm410_vm11 = vcmask 523264   ;;  %vm412_vm12 = vcmask 785408   ;;  %s601_s28 = smov [#allocation8]  }
  0x3c   :  { %444 = vmatmul.mubr.msk.f32.vlgmr.msra.gmra.mrb[0].mxu0 %vm58_vm2, %v55_v7  ;;  %466 = vmatprep.subr.mxu0 %v595_v2  ;;  %s432_s29 = sshll.u32 %s601_s28, 4  ;;  %s433_s29 = int_to_ptr.vmem [resolvable:$true] %s432_s29 }
  0x3d   :  { %491 = vset.pattern.permute.xlu0 %v597_v9  ;;  %467 = vmatpush3.msk.msra.mxu0 %vm62_vm0, %v234_v8  ;;  %s560_s30 = scalar_lea.vmem %s433_s29, 64  ;;  %p565_p11 = scmp.lt.s32.totalorder %s433_s29, %s433_s29 }
  0x3e   :  { %229 = vperm.xlu0 %491, %v140_v3   ;;  %471 = vmatprep.subr.mxu1 %v595_v2  ;;  %p561_p10 = scmp.ne.s32.totalorder %s433_s29, %s560_s30  ;;  %p566_p12 = scmp.lt.s32.totalorder %s560_s30, %s560_s30 }
  0x3f   :  { %468 = vmatprep.mubr.msk.f32.mxu0 %vm596_vm3, %v595_v2 }
  0x40   :  { %p567_p13 = por %p566_p12, %p565_p11 }
  0x42   :  { %493 = vset.pattern.permute.xlu0 %v594_v1  ;;  %p568_p0 = pnand %p567_p13, %p561_p10 }
  0xb8   :  { %v145_v12 = vpop.permute.xlu0 %144  ;;  %v313_v13 = vpop.permute.xlu1 %312 }
  0xb9   :  { %vm146_vm5 = vcmp.eq.s32.totalorder %v142_v11, %v145_v12  ;;  %vm314_vm6 = vcmp.eq.s32.totalorder %v142_v11, %v313_v13 }
  0xba   :  { %v445_v15 = vsel %vm146_vm5, 1.0, %v595_v2  ;;  %v451_v16 = vsel %vm314_vm6, 1.0, %v595_v2 }
  0xbb   :  { %464 = vmatmul.mubr.msk.f32.vlgmr.msra.gmra.mrb[0].mxu1 %vm150_vm4, %v445_v15 }
  0xbc   :  { %472 = vmatpush3.msk.msra.mxu1 %vm322_vm7, %v317_v14  ;;  %473 = vmatprep.mubr.msk.f32.mxu1 %vm596_vm3, %v595_v2 }
  0xbd   :  { %v230_v17 = vpop.permute.xlu0 %229 }
  0xbe   :  { %vm231_vm9 = vcmp.eq.s32.totalorder %v142_v11, %v230_v17 }
  0xbf   :  { %v448_v18 = vsel %vm231_vm9, 1.0, %v595_v2  ;;  %474 = vmatmul.mubr.msk.f32.vlgmr.msra.gmra.mrb[2].mxu1 %vm318_vm8, %v451_v16 }
  0xc0   :  { %469 = vmatmul.mubr.msk.f32.vlgmr.msra.gmra.mrb[2].mxu0 %vm58_vm2, %v448_v18 }
 0x10f   :  { %v135_v19 = vpop.f32.mrb[0].mxu0 }
 0x110   :  { %v137_v20 = vpop.f32.mrb[1].mxu0 }
 0x18e   :  { %v224_v21 = vpop.f32.mrb[0].mxu1 }
 0x18f   :  { %397 = vrot.lane.b32.xlu1 %v224_v21, %s598_s1  ;;  %v465_v22 = vpop.f32.mrb[1].mxu1 }
 0x192   :  { %v392_v23 = vpop.f32.mrb[2].mxu1 }
 0x193   :  { %v307_v24 = vpop.f32.mrb[2].mxu0  ;;  %v475_v25 = vpop.f32.mrb[3].mxu1  ;;  %405 = vrot.lane.b32.xlu0 %v392_v23, %s599_s3 }
 0x194   :  { %401 = vrot.lane.b32.xlu1 %v307_v24, %s600_s27  ;;  %v470_v26 = vpop.f32.mrb[3].mxu0 }
 0x201   :  { %v398_v27 = vpop.permute.xlu1 %397 }
 0x202   :  { %v409_v29 = vsel %vm408_vm10, %v137_v20, %v398_v27 }
 0x205   :  { %v406_v28 = vpop.permute.xlu0 %405 }
 0x206   :  { %v402_v30 = vpop.permute.xlu1 %401 }
 0x207   :  { %v411_v31 = vsel %vm410_vm11, %v409_v29, %v402_v30 }
 0x208   :  { %v413_v32 = vsel %vm412_vm12, %v411_v31, %v406_v28 }
 0x209   :  { %v416_v33 = vcombine.low %v135_v19, %v413_v32 }
 0x20b   :  { %454 = vst.sshfl [vmem:[#allocation8] sm:$0x33 pattern:$0x76325410] %v416_v33 }
 0x20c   :  { %571 = shalt.err (!%p568_p0)
}
 0x20d   :  { %s572_s7 = scalar_lea.hbm %s690_s4, 64 }
 0x20e   :  { %p573_p1 = scmp.ne.s32.totalorder %s690_s4, %s572_s7  ;;  %p576_p2 = scmp.lt.u32.totalorder %s572_s7, %s690_s4 }
 0x210   :  { %p578_p3 = pnand %p576_p2, %p573_p1 }
 0x212   :  { %581 = shalt.err (!%p578_p3)
}
 0x213   :  { %435 = dma.vmem_to_hbm [thread:$0]  %s433_s29, 64, %s690_s4, [#allocation4]  }
 0x214   :  { %586 = dma.done.wait [#allocation4], 64  }
 0x215   :  { %587 = vsyncadd [#allocation4], 4294967232 }
 0x216   :  { %439 = vsyncpa [#allocation3], 1 }
 0x217   :  { %440 = vsyncpa [#allocation6], 1 }
 0x218   :  { %441 = vsyncpa [#allocation4], 1 }

</bundles_post_ra>
